<compile_context>
chip_gen: v5e
topology: v5e:2x2
jax: 0.10.0
libtpu: 0.0.40
codegen_flags: <defaults>
</compile_context>

<pallas_src>
import functools

import jax
import jax.numpy as jnp
from jax.experimental import pallas as pl
from jax.experimental.pallas import tpu as pltpu

BETA = 1.0             # Smooth-L1 beta (base loss of the dimension head)
LANES = 384            # 3 components * 128 boxes per lane-dense row
NUM_PARTIALS = 2       # leading "parallel" grid axis (one partial / TC on v7x)
MAX_TILE_ROWS = 1024   # 1024 x 384 f32 = 1.5 MiB per input per buffer


def _round_up(x, m):
    return ((x + m - 1) // m) * m


def _smooth_l1(diff):
    adiff = jnp.abs(diff)
    return jnp.where(adiff < BETA, (0.5 / BETA) * diff * diff, adiff - 0.5 * BETA)


def _dim_loss_sum_kernel(value_ref, label_ref, weight_ref, avgrow_ref, partial_ref):
    """Accumulate the weighted Smooth-L1 sum into a resident (8, 384) partial."""
    i = pl.program_id(1)

    @pl.when(i == 0)
    def _():
        partial_ref[...] = jnp.zeros_like(partial_ref)

    v = value_ref[...].astype(jnp.float32)
    l = label_ref[...].astype(jnp.float32)
    w = weight_ref[...].astype(jnp.float32)

    # target = label - avg  =>  value - target = value - label + avg_row
    diff = v - l + avgrow_ref[...]                  # (TR, 384) + (1, 384)
    loss = _smooth_l1(diff) * w

    # VPU-only partial reduction: collapse sublane groups of 8 into the
    # resident accumulator; final cross-lane reduce is done in the wrapper.
    partial_ref[...] += jnp.sum(loss.reshape(-1, 8, LANES), axis=0)


def _dim_loss_elem_kernel(value_ref, label_ref, weight_ref, avgrow_ref, out_ref):
    """Elementwise (reduction='none') weighted Smooth-L1."""
    v = value_ref[...].astype(jnp.float32)
    l = label_ref[...].astype(jnp.float32)
    w = weight_ref[...].astype(jnp.float32)
    diff = v - l + avgrow_ref[...]
    out_ref[...] = (_smooth_l1(diff) * w).astype(out_ref.dtype)


@functools.partial(jax.jit, static_argnames=("reduction",))
def dimension_loss(value, label, weight=None, avg_dim=None, reduction="mean"):
    """value/label/weight: (N, 3); avg_dim: (3,). Smooth-L1 base loss."""
    n, d = value.shape
    assert d == 3
    if weight is None:
        weight = jnp.ones_like(value)

    # Lane-dense rows: each row of the (R, 384) view covers 128 boxes.
    r_min = pl.cdiv(n, 128)
    parts = NUM_PARTIALS if reduction in ("mean", "sum") else 1
    steps = max(1, pl.cdiv(r_min, parts * MAX_TILE_ROWS))
    tile_rows = _round_up(pl.cdiv(r_min, parts * steps), 8)
    r_pad = parts * steps * tile_rows
    n_pad = r_pad * 128

    def _prep(x):
        flat = x.reshape(-1)
        pad = n_pad * 3 - flat.shape[0]
        if pad:
            flat = jnp.pad(flat, (0, pad))  # weight pads with 0 -> contributes 0
        return flat.reshape(r_pad, LANES)

    v2, l2, w2 = _prep(value), _prep(label), _prep(weight)

    # Lane-dense avg row: [a0, a1, a2] repeated 128x -> (1, 384), built once.
    avg_row = jnp.tile(avg_dim.astype(jnp.float32).reshape(1, 3), (1, LANES // 3))

    elems = r_pad * LANES
    cost = pl.CostEstimate(
        flops=9 * elems,
        transcendentals=0,
        bytes_accessed=3 * elems * value.dtype.itemsize + LANES * 4,
    )

    if reduction in ("mean", "sum"):
        in_spec = pl.BlockSpec((tile_rows, LANES), lambda p, i: (p * steps + i, 0))
        avg_spec = pl.BlockSpec((1, LANES), lambda p, i: (0, 0))
        out_spec = pl.BlockSpec((None, 8, LANES), lambda p, i: (p, 0, 0))

        partials = pl.pallas_call(
            _dim_loss_sum_kernel,
            out_shape=jax.ShapeDtypeStruct((NUM_PARTIALS, 8, LANES), jnp.float32),
            grid_spec=pltpu.PrefetchScalarGridSpec(
                num_scalar_prefetch=0,
                grid=(NUM_PARTIALS, steps),
                in_specs=[in_spec, in_spec, in_spec, avg_spec],
                out_specs=out_spec,
            ),
            compiler_params=pltpu.CompilerParams(
                dimension_semantics=("parallel", "arbitrary")),
            cost_estimate=cost,
        )(v2, l2, w2, avg_row)

        total = jnp.sum(partials)
        if reduction == "sum":
            return total
        return total / jnp.float32(n * d)   # mean over the N*3 real elements

    # reduction == 'none': elementwise weighted loss map.
    in_spec = pl.BlockSpec((tile_rows, LANES), lambda i: (i, 0))
    avg_spec = pl.BlockSpec((1, LANES), lambda i: (0, 0))
    out = pl.pallas_call(
        _dim_loss_elem_kernel,
        out_shape=jax.ShapeDtypeStruct((r_pad, LANES), jnp.float32),
        grid_spec=pltpu.PrefetchScalarGridSpec(
            num_scalar_prefetch=0,
            grid=(steps,),
            in_specs=[in_spec, in_spec, in_spec, avg_spec],
            out_specs=pl.BlockSpec((tile_rows, LANES), lambda i: (i, 0)),
        ),
        compiler_params=pltpu.CompilerParams(dimension_semantics=("parallel",)),
        cost_estimate=cost,
    )(v2, l2, w2, avg_row)
    return out.reshape(n_pad, 3)[:n]


def _reference(value, label, weight, avg_dim, reduction="mean"):
    target = label - avg_dim[None, :]
    diff = value - target
    adiff = jnp.abs(diff)
    loss = jnp.where(adiff < BETA, 0.5 * diff * diff / BETA, adiff - 0.5 * BETA)
    loss = loss * weight
    if reduction == "mean":
        return jnp.mean(loss)
    if reduction == "sum":
        return jnp.sum(loss)
    return loss


if __name__ == "__main__":
    key = jax.random.PRNGKey(0)
    k1, k2, k3 = jax.random.split(key, 3)

    N, D = 64, 3
    value = jax.random.normal(k1, (N, D), dtype=jnp.float32) * 2.0
    label = jax.random.normal(k2, (N, D), dtype=jnp.float32) * 2.0 + 1.0
    weight = jax.random.uniform(k3, (N, D), dtype=jnp.float32)

    # Deterministic registered buffer (module's avg_dim).
    avg_dim = jnp.array([1.6, 1.8, 3.9], dtype=jnp.float32)

    out_mean = jax.block_until_ready(
        dimension_loss(value, label, weight, avg_dim, reduction="mean"))
    out_sum = jax.block_until_ready(
        dimension_loss(value, label, weight, avg_dim, reduction="sum"))
    out_none = jax.block_until_ready(
        dimension_loss(value, label, weight, avg_dim, reduction="none"))

    ref_mean = _reference(value, label, weight, avg_dim, reduction="mean")
    ref_sum = _reference(value, label, weight, avg_dim, reduction="sum")
    ref_none = _reference(value, label, weight, avg_dim, reduction="none")

    assert jnp.allclose(out_mean, ref_mean, rtol=1e-5, atol=1e-5), (out_mean, ref_mean)
    assert jnp.allclose(out_sum, ref_sum, rtol=1e-5, atol=1e-5), (out_sum, ref_sum)
    assert jnp.allclose(out_none, ref_none, rtol=1e-5, atol=1e-5)

    # TODO(synk): base_loss is fixed to Smooth-L1 (beta=1.0); other
    # build_base_loss configs would need their own elementwise formula here.
    print("KERNEL_OK")
</pallas_src>

<mosaic_0001>
module attributes {stable_mosaic.version = 11 : i64} {
  func.func @_dim_loss_sum_kernel(%arg0: i32, %arg1: i32, %arg2: memref<8x384xf32, #tpu.memory_space<vmem>>, %arg3: memref<8x384xf32, #tpu.memory_space<vmem>>, %arg4: memref<8x384xf32, #tpu.memory_space<vmem>>, %arg5: memref<1x384xf32, #tpu.memory_space<vmem>>, %arg6: memref<1x8x384xf32, #tpu.memory_space<vmem>>) attributes {dimension_semantics = [#tpu.dimension_semantics<parallel>, #tpu.dimension_semantics<arbitrary>], iteration_bounds = array<i64: 2, 1>, scalar_prefetch = 0 : i64, scratch_operands = 0 : i64, tpu.core_type = #tpu.core_type<tc>, window_params = [{transform_indices = @transform_0, window_bounds = array<i64: 8, 384>}, {transform_indices = @transform_1, window_bounds = array<i64: 8, 384>}, {transform_indices = @transform_2, window_bounds = array<i64: 8, 384>}, {pipeline_mode = #tpu.pipeline_mode<synchronous>, transform_indices = @transform_3, window_bounds = array<i64: 1, 384>}, {transform_indices = @transform_4, window_bounds = array<i64: 1, 8, 384>}]} {
    %c0_i32 = arith.constant 0 : i32
    %0 = arith.cmpi eq, %arg1, %c0_i32 : i32
    %1 = arith.extui %0 : i1 to i32
    %c0_i32_0 = arith.constant 0 : i32
    %2 = arith.cmpi ne, %1, %c0_i32_0 : i32
    scf.if %2 {
      %cst_17 = arith.constant 0.000000e+00 : f32
      %28 = vector.broadcast %cst_17 : f32 to vector<8x384xf32>
      %c0_18 = arith.constant 0 : index
      %c0_19 = arith.constant 0 : index
      %c0_20 = arith.constant 0 : index
      %29 = vector.load %arg6[%c0_18, %c0_19, %c0_20] : memref<1x8x384xf32, #tpu.memory_space<vmem>>, vector<1x8x384xf32>
      %30 = vector.shape_cast %29 : vector<1x8x384xf32> to vector<8x384xf32>
      %31 = vector.shape_cast %28 : vector<8x384xf32> to vector<1x8x384xf32>
      tpu.vector_store %arg6[%c0_18, %c0_19, %c0_20], %31 {strides = array<i32>} : memref<1x8x384xf32, #tpu.memory_space<vmem>>, vector<1x8x384xf32>,
    } else {
    }
    %c0 = arith.constant 0 : index
    %c0_1 = arith.constant 0 : index
    %3 = vector.load %arg2[%c0, %c0_1] : memref<8x384xf32, #tpu.memory_space<vmem>>, vector<8x384xf32>
    %c0_2 = arith.constant 0 : index
    %c0_3 = arith.constant 0 : index
    %4 = vector.load %arg3[%c0_2, %c0_3] : memref<8x384xf32, #tpu.memory_space<vmem>>, vector<8x384xf32>
    %c0_4 = arith.constant 0 : index
    %c0_5 = arith.constant 0 : index
    %5 = vector.load %arg4[%c0_4, %c0_5] : memref<8x384xf32, #tpu.memory_space<vmem>>, vector<8x384xf32>
    %6 = arith.subf %3, %4 : vector<8x384xf32>
    %c0_6 = arith.constant 0 : index
    %c0_7 = arith.constant 0 : index
    %7 = vector.load %arg5[%c0_6, %c0_7] : memref<1x384xf32, #tpu.memory_space<vmem>>, vector<1x384xf32>
    %8 = vector.broadcast %7 : vector<1x384xf32> to vector<8x384xf32>
    %9 = arith.addf %6, %8 : vector<8x384xf32>
    %10 = math.absf %9 : vector<8x384xf32>
    %cst = arith.constant 1.000000e+00 : f32
    %11 = vector.broadcast %cst : f32 to vector<8x384xf32>
    %12 = arith.cmpf olt, %10, %11 : vector<8x384xf32>
    %cst_8 = arith.constant 5.000000e-01 : f32
    %13 = vector.broadcast %cst_8 : f32 to vector<8x384xf32>
    %14 = arith.mulf %13, %9 : vector<8x384xf32>
    %15 = arith.mulf %14, %9 : vector<8x384xf32>
    %cst_9 = arith.constant 5.000000e-01 : f32
    %16 = vector.broadcast %cst_9 : f32 to vector<8x384xf32>
    %17 = arith.subf %10, %16 : vector<8x384xf32>
    %18 = arith.select %12, %15, %17 : vector<8x384xi1>, vector<8x384xf32>
    %19 = arith.mulf %18, %5 : vector<8x384xf32>
    %c0_10 = arith.constant 0 : index
    %c0_11 = arith.constant 0 : index
    %c0_12 = arith.constant 0 : index
    %20 = vector.load %arg6[%c0_10, %c0_11, %c0_12] : memref<1x8x384xf32, #tpu.memory_space<vmem>>, vector<1x8x384xf32>
    %21 = vector.shape_cast %20 : vector<1x8x384xf32> to vector<8x384xf32>
    %22 = vector.shape_cast %19 : vector<8x384xf32> to vector<1x8x384xf32>
    %cst_13 = arith.constant dense<0.000000e+00> : vector<8x384xf32>
    %23 = vector.multi_reduction <add>, %22, %cst_13 [0] : vector<1x8x384xf32> to vector<8x384xf32>
    %24 = arith.addf %21, %23 : vector<8x384xf32>
    %c0_14 = arith.constant 0 : index
    %c0_15 = arith.constant 0 : index
    %c0_16 = arith.constant 0 : index
    %25 = vector.load %arg6[%c0_14, %c0_15, %c0_16] : memref<1x8x384xf32, #tpu.memory_space<vmem>>, vector<1x8x384xf32>
    %26 = vector.shape_cast %25 : vector<1x8x384xf32> to vector<8x384xf32>
    %27 = vector.shape_cast %24 : vector<8x384xf32> to vector<1x8x384xf32>
    tpu.vector_store %arg6[%c0_14, %c0_15, %c0_16], %27 {strides = array<i32>} : memref<1x8x384xf32, #tpu.memory_space<vmem>>, vector<1x8x384xf32>,
    return
  }
  func.func @transform_0(%arg0: i32, %arg1: i32) -> (i32, i32) {
    %c1_i32 = arith.constant 1 : i32
    %0 = arith.muli %arg0, %c1_i32 : i32
    %1 = arith.addi %0, %arg1 : i32
    %c0_i32 = arith.constant 0 : i32
    %c0_i32_0 = arith.constant 0 : i32
    return %1, %c0_i32 : i32, i32
  }
  func.func @transform_1(%arg0: i32, %arg1: i32) -> (i32, i32) {
    %c1_i32 = arith.constant 1 : i32
    %0 = arith.muli %arg0, %c1_i32 : i32
    %1 = arith.addi %0, %arg1 : i32
    %c0_i32 = arith.constant 0 : i32
    %c0_i32_0 = arith.constant 0 : i32
    return %1, %c0_i32 : i32, i32
  }
  func.func @transform_2(%arg0: i32, %arg1: i32) -> (i32, i32) {
    %c1_i32 = arith.constant 1 : i32
    %0 = arith.muli %arg0, %c1_i32 : i32
    %1 = arith.addi %0, %arg1 : i32
    %c0_i32 = arith.constant 0 : i32
    %c0_i32_0 = arith.constant 0 : i32
    return %1, %c0_i32 : i32, i32
  }
  func.func @transform_3(%arg0: i32, %arg1: i32) -> (i32, i32) {
    %c0_i32 = arith.constant 0 : i32
    %c0_i32_0 = arith.constant 0 : i32
    %c0_i32_1 = arith.constant 0 : i32
    return %c0_i32, %c0_i32_0 : i32, i32
  }
  func.func @transform_4(%arg0: i32, %arg1: i32) -> (i32, i32, i32) {
    %c0_i32 = arith.constant 0 : i32
    %c0_i32_0 = arith.constant 0 : i32
    %c0_i32_1 = arith.constant 0 : i32
    return %arg0, %c0_i32, %c0_i32_0 : i32, i32, i32
  }
}

</mosaic_0001>

<bundles_post_ra>
// kernel: dimension_loss.1
= control target key start
LH: loop header
LB: loop body
LE: loop exit
PB: predicated region body
PF: predicated region fallthrough
CT: control target
= control target key end

     0   :  { %s510_s15 = smov 0   ;;  %s512_s16 = smov 0   ;;  %s558_s0 = inlined_call_operand.vmem [shape: f32[16,384], index: 0, kind: input, shape index: {}]   ;;  %s559_s1 = inlined_call_operand.vmem [shape: f32[16,384], index: 1, kind: input, shape index: {}]   ;;  %s560_s2 = inlined_call_operand.vmem [shape: f32[16,384], index: 2, kind: input, shape index: {}]   ;;  %s561_s3 = inlined_call_operand.vmem [shape: f32[1,384], index: 3, kind: input, shape index: {}]   ;;  %s562_s4 = inlined_call_operand.vmem [shape: f32[2,8,384], index: 4, kind: output, shape index: {}]  }
   0x1   :  { %s514_s17 = smov 0  }
   0x2 LB: > { %s26_s18 = sadd.s32 1, %s479_s16  ;;  %p425_p0 = scmp.ge.s32.totalorder %s483_s17, 1  ;;  %s483_s17 = sphi %s514_s17, %s14_s17   ;;  %s479_s16 = sphi %s512_s16, %s564_s16   ;;  %s475_s15 = sphi %s510_s15, %s563_s15  }
   0x3   : > { %p28_p1 = scmp.ge.s32.totalorder %s26_s18, 2  ;;  %p206_p2 = scmp.lt.s32.totalorder %s483_s17, 3 }
   0x5   : > { %s566_s18 = smov (%p28_p1, %s26_s18), 0  ;;  %p207_p3 = pnand %p425_p0, %p206_p2 }
   0x6   : > { %p246_p4 = scmp.lt.s32.totalorder (!%p207_p3), %s475_s15, 1 }
   0x7   : > { %210 = sbr.rel (%p207_p3) target bundleno = 32 (0x20), region = 36 }
   0xc   : > { %s568_s15 = smov (!%p246_p4, %s475_s15), 1  ;;  %v290_v0 = vld [vmem:[%s561_s3] sm:$0x7] }
   0xd   : > { %s528_s19 = smul.u32 24, %s568_s15  ;;  %v292_v2 = vperm.slane %v290_v0, 0  ;;  %v293_v4 = vperm.slane %v290_v0, 1  ;;  %v294_v8 = vperm.slane %v290_v0, 2 }
   0xf   : > { %s250_s24 = scalar_lea.vmem %s558_s0, %s528_s19  ;;  %s257_s27 = scalar_lea.vmem %s559_s1, %s528_s19 }
  0x10   : > { %v278_v1 = vld [vmem:[%s250_s24] sm:$0xff]  ;;  %v279_v3 = vld [vmem:[%s250_s24 + $0x8] sm:$0xff]  ;;  %v280_v5 = vld [vmem:[%s250_s24 + $0x10] sm:$0xff]  ;;  %s264_s30 = scalar_lea.vmem %s560_s2, %s528_s19  ;;  %s270_s7 = scalar_lea.vmem %s562_s4, %s528_s19 }
  0x11   : > { %v281_v6 = vld [vmem:[%s257_s27] sm:$0xff]  ;;  %v282_v7 = vld [vmem:[%s257_s27 + $0x8] sm:$0xff]  ;;  %v283_v11 = vld [vmem:[%s257_s27 + $0x10] sm:$0xff] }
  0x12   : > { %v287_v9 = vsub.f32 %v278_v1, %v281_v6  ;;  %v288_v10 = vsub.f32 %v279_v3, %v282_v7  ;;  %v289_v12 = vsub.f32 %v280_v5, %v283_v11  ;;  %v284_v22 = vld [vmem:[%s264_s30] sm:$0xff]  ;;  %v285_v25 = vld [vmem:[%s264_s30 + $0x8] sm:$0xff]  ;;  %v286_v30 = vld [vmem:[%s264_s30 + $0x10] sm:$0xff] }
  0x14   : > { %v298_v13 = vadd.f32 %v292_v2, %v287_v9  ;;  %v299_v14 = vadd.f32 %v293_v4, %v288_v10  ;;  %v300_v15 = vadd.f32 %v294_v8, %v289_v12 }
  0x16   : > { %v301_v16 = vand.u32 2147483647, %v298_v13  ;;  %v307_v17 = vmul.f32 0.5, %v298_v13  ;;  %v302_v18 = vand.u32 2147483647, %v299_v14  ;;  %v308_v19 = vmul.f32 0.5, %v299_v14 }
  0x17   : > { %v303_v20 = vand.u32 2147483647, %v300_v15  ;;  %v309_v21 = vmul.f32 0.5, %v300_v15 }
  0x18   : > { %vm304_vm0 = vcmp.lt.f32.partialorder %v301_v16, 1.0  ;;  %v310_v23 = vmul.f32 %v307_v17, %v298_v13  ;;  %v430_v24 = vadd.f32 -0.5, %v301_v16  ;;  %vm305_vm1 = vcmp.lt.f32.partialorder %v302_v18, 1.0 }
  0x19   : > { %v311_v26 = vmul.f32 %v308_v19, %v299_v14  ;;  %v431_v27 = vadd.f32 -0.5, %v302_v18  ;;  %vm306_vm2 = vcmp.lt.f32.partialorder %v303_v20, 1.0  ;;  %v312_v28 = vmul.f32 %v309_v21, %v300_v15 }
  0x1a   : > { %v316_v29 = vsel %vm304_vm0, %v310_v23, %v430_v24  ;;  %v432_v31 = vadd.f32 -0.5, %v303_v20 }
  0x1b   : > { %v319_v32 = vmul.f32 %v316_v29, %v284_v22  ;;  %v317_v33 = vsel %vm305_vm1, %v311_v26, %v431_v27 }
  0x1c   : > { %v320_v34 = vmul.f32 %v317_v33, %v285_v25  ;;  %v318_v35 = vsel %vm306_vm2, %v312_v28, %v432_v31 }
  0x1d   : > { %v321_v36 = vmul.f32 %v318_v35, %v286_v30  ;;  %331 = vst [vmem:[%s270_s7] sm:$0xff] %v319_v32 }
  0x1e   : > { %332 = vst [vmem:[%s270_s7 + $0x8] sm:$0xff] %v320_v34 }
  0x1f   : > { %333 = vst [vmem:[%s270_s7 + $0x10] sm:$0xff] %v321_v36 }
  0x20 PF: > { %s14_s17 = sadd.s32 1, %s483_s17   ;;  %s563_s15 = smov %s479_s16 }
  0x21   : > { %p11_p5 = scmp.ge.s32.totalorder %s14_s17, 4   ;;  %s564_s16 = smov %s566_s18 }
  0x23   :  { %13 = sbr.rel (!%p11_p5) target bundleno = 2 (0x2), region = 76 }

</bundles_post_ra>
